<compile_context>
chip_gen: v5e
topology: v5e:2x2
jax: 0.10.0
libtpu: 0.0.40
codegen_flags: <defaults>
</compile_context>

<pallas_src>
import functools

import jax
import jax.numpy as jnp
from jax.experimental import pallas as pl
from jax.experimental.pallas import tpu as pltpu


def _round_up(x, m):
    return (x + m - 1) // m * m


def _pick_batch_block(n, max_blk=8):
    for b in range(min(n, max_blk), 0, -1):
        if n % b == 0:
            return b
    return 1


def _swarm_kernel(x_ref, hfull_ref, htile_ref, c_ref, w_ref, u_ref, b_ref,
                  h_out_ref, c_out_ref, a_ref,
                  *, n_in, n_out, n_in_p, n_out_p):
    # x_ref     : (B, n_in,  E_blk)       htile_ref : (B, n_out, E_blk)
    # hfull_ref : (B, n_out, E_pad)       c_ref     : (B, n_out, E_blk)
    # w_ref     : (4*n_out, K_pad)  fused [Wih | Whh | Whp] with zero pad cols
    # u_ref     : (E_pad, E_blk)    scaled-causal column tile
    # b_ref     : (4*n_out, 1)
    # a_ref     : (K_pad, E_blk) scratch holding A = [x ; h ; h@U] with
    #             sublane-aligned row blocks; pad rows are kept zero.
    B = x_ref.shape[0]

    # Zero the pad rows every invocation (cheap; megacore-safe, no stale VMEM).
    a_ref[...] = jnp.zeros_like(a_ref)

    for b in range(B):
        # CAUSAL pool applied to h *before* the Whp projection:
        #   Whp @ cummean_over_E(h)  ==  Whp @ (h @ U)
        hu = jnp.dot(hfull_ref[b], u_ref[...],
                     preferred_element_type=jnp.float32)            # (n_out, E_blk)

        # Assemble A = [x ; h ; h@U] (row blocks at sublane-aligned offsets).
        a_ref[0:n_in, :] = x_ref[b]
        a_ref[n_in_p:n_in_p + n_out, :] = htile_ref[b]
        a_ref[n_in_p + n_out_p:n_in_p + n_out_p + n_out, :] = hu.astype(a_ref.dtype)

        # Single fused MXU matmul -> all four gate pre-activations.
        pre = jnp.dot(w_ref[...], a_ref[...],
                      preferred_element_type=jnp.float32) + b_ref[...]   # (4n, E_blk)

        ig = jax.nn.sigmoid(pre[0 * n_out:1 * n_out, :])
        fg = jax.nn.sigmoid(pre[1 * n_out:2 * n_out, :])
        og = jax.nn.sigmoid(pre[2 * n_out:3 * n_out, :])
        d = jnp.tanh(pre[3 * n_out:4 * n_out, :])

        c_new = c_ref[b].astype(jnp.float32) * fg + d * ig
        h_new = og * jnp.tanh(c_new)

        h_out_ref[b] = h_new.astype(h_out_ref.dtype)
        c_out_ref[b] = c_new.astype(c_out_ref.dtype)


def _swarm_init_kernel(x_ref, w_ref, b_ref, h_out_ref, c_out_ref, *, n_out):
    # hc=None fast path: h = c = 0  =>  pool = 0 and c*fg = 0.
    # w_ref : (3*n_out, n_in) rows [ig; og; d]    b_ref : (3*n_out, 1)
    B = x_ref.shape[0]
    for b in range(B):
        pre = jnp.dot(w_ref[...], x_ref[b],
                      preferred_element_type=jnp.float32) + b_ref[...]
        ig = jax.nn.sigmoid(pre[0 * n_out:1 * n_out, :])
        og = jax.nn.sigmoid(pre[1 * n_out:2 * n_out, :])
        d = jnp.tanh(pre[2 * n_out:3 * n_out, :])
        c_new = d * ig
        h_new = og * jnp.tanh(c_new)
        h_out_ref[b] = h_new.astype(h_out_ref.dtype)
        c_out_ref[b] = c_new.astype(c_out_ref.dtype)


def swarm_conv_lstm_cell(x, hc, wih, whh, whp, bias, *, n_out,
                         operand_dtype=jnp.bfloat16,
                         batch_block=None, e_block=None):
    """Forward of SwarmConvLSTMCell (pooling='CAUSAL', n_dim=2).

    x    : (N, n_in, H, W)   NCHW, like the PyTorch module
    hc   : None or (h, c), each (N, n_out, H, W)
    wih  : (4*n_out, n_in) [or (4*n_out, n_in, 1, 1)]  1x1-conv weight
    whh  : (4*n_out, n_out),  whp : (4*n_out, n_out),  bias : (4*n_out,)
    operand_dtype : dtype fed to the MXU (accumulation is always f32).
    returns (h, c), each (N, n_out, H, W)
    """
    N, n_in, H, W = x.shape
    E = H * W
    E_pad = _round_up(E, 128)                 # lane-dense stores
    out_dtype = x.dtype
    operand_dtype = jnp.dtype(operand_dtype)

    wih = jnp.asarray(wih).reshape(4 * n_out, n_in)
    whh = jnp.asarray(whh).reshape(4 * n_out, n_out)
    whp = jnp.asarray(whp).reshape(4 * n_out, n_out)
    b2d = jnp.asarray(bias).astype(jnp.float32).reshape(4 * n_out, 1)

    B_blk = batch_block if batch_block is not None else _pick_batch_block(N)
    assert N % B_blk == 0, "batch_block must divide N"

    if e_block is None:
        E_blk = min(E_pad, 512)               # caps the per-step U tile footprint
    else:
        E_blk = min(_round_up(e_block, 128), E_pad)
    while E_pad % E_blk:
        E_blk -= 128
    grid = (N // B_blk, E_pad // E_blk)

    def to_nce(a, nchan, dtype):
        # NCHW -> (N, C, E) is a free reshape; pad E up to the lane multiple.
        a = a.reshape(N, nchan, E)
        if E_pad != E:
            a = jnp.pad(a, ((0, 0), (0, 0), (0, E_pad - E)))
        return a.astype(dtype)

    x_nce = to_nce(x, n_in, operand_dtype)

    cparams = pltpu.CompilerParams(dimension_semantics=("parallel", "parallel"))
    out_shape = (jax.ShapeDtypeStruct((N, n_out, E_pad), out_dtype),
                 jax.ShapeDtypeStruct((N, n_out, E_pad), out_dtype))
    out_specs = [
        pl.BlockSpec((B_blk, n_out, E_blk), lambda bi, ei: (bi, 0, ei)),
        pl.BlockSpec((B_blk, n_out, E_blk), lambda bi, ei: (bi, 0, ei)),
    ]
    out_bytes = 2 * N * n_out * E_pad * jnp.dtype(out_dtype).itemsize

    if hc is None:
        # Forget-gate rows dropped: only ig / og / d are needed when h = c = 0.
        w3 = jnp.concatenate([wih[0:n_out], wih[2 * n_out:4 * n_out]], axis=0)
        w3 = w3.astype(operand_dtype)
        b3 = jnp.concatenate([b2d[0:n_out], b2d[2 * n_out:4 * n_out]], axis=0)

        kernel = functools.partial(_swarm_init_kernel, n_out=n_out)
        cost = pl.CostEstimate(
            flops=int(2 * N * 3 * n_out * n_in * E_pad),
            transcendentals=int(4 * N * n_out * E_pad),
            bytes_accessed=int(x_nce.size * x_nce.dtype.itemsize
                               + w3.size * w3.dtype.itemsize
                               + b3.size * 4 + out_bytes))
        grid_spec = pltpu.PrefetchScalarGridSpec(
            num_scalar_prefetch=0, grid=grid,
            in_specs=[
                pl.BlockSpec((B_blk, n_in, E_blk), lambda bi, ei: (bi, 0, ei)),
                pl.BlockSpec((3 * n_out, n_in), lambda bi, ei: (0, 0)),
                pl.BlockSpec((3 * n_out, 1), lambda bi, ei: (0, 0)),
            ],
            out_specs=out_specs)
        h_out, c_out = pl.pallas_call(
            kernel, out_shape=out_shape, grid_spec=grid_spec,
            compiler_params=cparams, cost_estimate=cost,
        )(x_nce, w3, b3)
    else:
        h_in, c_in = hc
        h_nce = to_nce(h_in, n_out, operand_dtype)
        c_nce = to_nce(c_in, n_out, out_dtype)        # stays f32 for gate math

        # Sublane granularity of the operand dtype (8 rows per 32-bit sublane).
        sub = 8 * (4 // operand_dtype.itemsize)
        n_in_p = _round_up(n_in, sub)
        n_out_p = _round_up(n_out, sub)
        k_pad = n_in_p + 2 * n_out_p

        # Fused weight W_all = [Wih | Whh | Whp] with zero columns at the pad
        # positions of A = [x ; h ; h@U].
        w_all = jnp.zeros((4 * n_out, k_pad), jnp.float32)
        w_all = w_all.at[:, 0:n_in].set(wih.astype(jnp.float32))
        w_all = w_all.at[:, n_in_p:n_in_p + n_out].set(whh.astype(jnp.float32))
        w_all = w_all.at[:, n_in_p + n_out_p:n_in_p + n_out_p + n_out].set(
            whp.astype(jnp.float32))
        w_all = w_all.astype(operand_dtype)

        # Scaled causal matrix: U[i, j] = (i <= j) / (j + 1), so that
        # (row-vector over E) @ U == cumulative mean over E (CAUSAL pooling).
        idx = jnp.arange(E_pad, dtype=jnp.int32)
        u = (idx[:, None] <= idx[None, :]).astype(jnp.float32)
        u = u / (jnp.arange(E_pad, dtype=jnp.float32) + 1.0)[None, :]
        u = u.astype(operand_dtype)

        kernel = functools.partial(_swarm_kernel, n_in=n_in, n_out=n_out,
                                   n_in_p=n_in_p, n_out_p=n_out_p)
        in_bytes = (x_nce.size * x_nce.dtype.itemsize
                    + 2 * h_nce.size * h_nce.dtype.itemsize
                    + c_nce.size * c_nce.dtype.itemsize
                    + w_all.size * w_all.dtype.itemsize
                    + (N // B_blk) * u.size * u.dtype.itemsize
                    + b2d.size * 4)
        cost = pl.CostEstimate(
            flops=int(2 * N * n_out * E_pad * E_pad
                      + 2 * N * 4 * n_out * k_pad * E_pad),
            transcendentals=int(5 * N * n_out * E_pad),
            bytes_accessed=int(in_bytes + out_bytes))
        grid_spec = pltpu.PrefetchScalarGridSpec(
            num_scalar_prefetch=0, grid=grid,
            in_specs=[
                # x, h (full width: pool K operand), h (lane tile: Whh operand), c
                pl.BlockSpec((B_blk, n_in, E_blk), lambda bi, ei: (bi, 0, ei)),
                pl.BlockSpec((B_blk, n_out, E_pad), lambda bi, ei: (bi, 0, 0)),
                pl.BlockSpec((B_blk, n_out, E_blk), lambda bi, ei: (bi, 0, ei)),
                pl.BlockSpec((B_blk, n_out, E_blk), lambda bi, ei: (bi, 0, ei)),
                # fused weights, U column tile, bias (resident via constant maps)
                pl.BlockSpec((4 * n_out, k_pad), lambda bi, ei: (0, 0)),
                pl.BlockSpec((E_pad, E_blk), lambda bi, ei: (0, ei)),
                pl.BlockSpec((4 * n_out, 1), lambda bi, ei: (0, 0)),
            ],
            out_specs=out_specs,
            scratch_shapes=[pltpu.VMEM((k_pad, E_blk), operand_dtype)])
        h_out, c_out = pl.pallas_call(
            kernel, out_shape=out_shape, grid_spec=grid_spec,
            compiler_params=cparams, cost_estimate=cost,
        )(x_nce, h_nce, h_nce, c_nce, w_all, u, b2d)

    # (N, C, E_pad) -> NCHW (drop causal-tail padding; free when E_pad == E).
    h_out = h_out[:, :, :E].reshape(N, n_out, H, W)
    c_out = c_out[:, :, :E].reshape(N, n_out, H, W)
    return h_out, c_out


def swarm_conv_lstm_cell_ref(x, hc, wih, whh, whp, bias, *, n_out):
    """Pure-JAX reference mirroring the PyTorch forward (CAUSAL pooling)."""
    N, n_in, H, W = x.shape

    def conv1x1(w, z):
        return jnp.einsum('oc,nchw->nohw', w, z)

    if hc is None:
        h = jnp.zeros((N, n_out, H, W), dtype=x.dtype)
        c = jnp.zeros((N, n_out, H, W), dtype=x.dtype)
        pool = 0.0
    else:
        h, c = hc
        p = jnp.cumsum(h.reshape(N, n_out, -1), axis=2)
        p = p / (jnp.arange(H * W, dtype=jnp.float32) + 1.0)[None, None, :]
        pool = conv1x1(whp, p.reshape(h.shape))

    tmp = conv1x1(wih, x) + bias[None, :, None, None] + conv1x1(whh, h) + pool
    tmp = tmp.reshape(N, 4, n_out, H, W)
    ig = jax.nn.sigmoid(tmp[:, 0])
    fg = jax.nn.sigmoid(tmp[:, 1])
    og = jax.nn.sigmoid(tmp[:, 2])
    d = jnp.tanh(tmp[:, 3])
    c_new = c * fg + d * ig
    h_new = og * jnp.tanh(c_new)
    return h_new, c_new


if __name__ == "__main__":
    # Small deterministic setup.  E = H*W = 256 (lane-dense, multiple of 128).
    N, n_in, n_out, H, W = 2, 4, 8, 16, 16

    key = jax.random.PRNGKey(0)
    k = jax.random.split(key, 7)

    x = jax.random.normal(k[0], (N, n_in, H, W), dtype=jnp.float32)
    h0 = jax.random.normal(k[1], (N, n_out, H, W), dtype=jnp.float32) * 0.5
    c0 = jax.random.normal(k[2], (N, n_out, H, W), dtype=jnp.float32) * 0.5

    wih = jax.random.normal(k[3], (4 * n_out, n_in), dtype=jnp.float32) * 0.3
    whh = jax.random.normal(k[4], (4 * n_out, n_out), dtype=jnp.float32) * 0.3
    whp = jax.random.normal(k[5], (4 * n_out, n_out), dtype=jnp.float32) * 0.3
    bias = jax.random.normal(k[6], (4 * n_out,), dtype=jnp.float32) * 0.1

    h_ref, c_ref = swarm_conv_lstm_cell_ref(
        x, (h0, c0), wih, whh, whp, bias, n_out=n_out)

    # 1) f32 MXU operands: tight check of the restructured algebra.
    h1, c1 = swarm_conv_lstm_cell(x, (h0, c0), wih, whh, whp, bias,
                                  n_out=n_out, operand_dtype=jnp.float32)
    jax.block_until_ready((h1, c1))
    assert jnp.allclose(h1, h_ref, rtol=1e-3, atol=2e-4), "h (f32) mismatch"
    assert jnp.allclose(c1, c_ref, rtol=1e-3, atol=2e-4), "c (f32) mismatch"

    # 2) default bf16 MXU operands (f32 accumulation): looser tolerance.
    h2, c2 = swarm_conv_lstm_cell(x, (h0, c0), wih, whh, whp, bias, n_out=n_out)
    jax.block_until_ready((h2, c2))
    assert jnp.allclose(h2, h_ref, rtol=5e-2, atol=5e-2), "h (bf16) mismatch"
    assert jnp.allclose(c2, c_ref, rtol=5e-2, atol=5e-2), "c (bf16) mismatch"

    # 3) Lane-tiled path (two E tiles, exercises the v7x-oriented E axis).
    h3, c3 = swarm_conv_lstm_cell(x, (h0, c0), wih, whh, whp, bias, n_out=n_out,
                                  operand_dtype=jnp.float32, e_block=128)
    jax.block_until_ready((h3, c3))
    assert jnp.allclose(h3, h_ref, rtol=1e-3, atol=2e-4), "h (tiled) mismatch"
    assert jnp.allclose(c3, c_ref, rtol=1e-3, atol=2e-4), "c (tiled) mismatch"

    # 4) hc=None fast path (3-gate weights).
    h4, c4 = swarm_conv_lstm_cell(x, None, wih, whh, whp, bias, n_out=n_out,
                                  operand_dtype=jnp.float32)
    jax.block_until_ready((h4, c4))
    h4r, c4r = swarm_conv_lstm_cell_ref(x, None, wih, whh, whp, bias, n_out=n_out)
    assert jnp.allclose(h4, h4r, rtol=1e-3, atol=2e-4), "h (no hc) mismatch"
    assert jnp.allclose(c4, c4r, rtol=1e-3, atol=2e-4), "c (no hc) mismatch"

    # 5) Non-lane-multiple spatial size (E=100 -> padded to 128).
    x5 = jax.random.normal(k[0], (N, n_in, 10, 10), dtype=jnp.float32)
    h5 = jax.random.normal(k[1], (N, n_out, 10, 10), dtype=jnp.float32) * 0.5
    c5 = jax.random.normal(k[2], (N, n_out, 10, 10), dtype=jnp.float32) * 0.5
    ho5, co5 = swarm_conv_lstm_cell(x5, (h5, c5), wih, whh, whp, bias,
                                    n_out=n_out, operand_dtype=jnp.float32)
    jax.block_until_ready((ho5, co5))
    hr5, cr5 = swarm_conv_lstm_cell_ref(x5, (h5, c5), wih, whh, whp, bias,
                                        n_out=n_out)
    assert jnp.allclose(ho5, hr5, rtol=1e-3, atol=2e-4), "h (padded E) mismatch"
    assert jnp.allclose(co5, cr5, rtol=1e-3, atol=2e-4), "c (padded E) mismatch"

    print("KERNEL_OK")
</pallas_src>

<mosaic_0001>
module attributes {stable_mosaic.version = 11 : i64} {
  func.func @_swarm_kernel(%arg0: i32, %arg1: i32, %arg2: memref<2x4x256xf32, #tpu.memory_space<vmem>>, %arg3: memref<2x8x256xf32, #tpu.memory_space<vmem>>, %arg4: memref<2x8x256xf32, #tpu.memory_space<vmem>>, %arg5: memref<2x8x256xf32, #tpu.memory_space<vmem>>, %arg6: memref<32x24xf32, #tpu.memory_space<vmem>>, %arg7: memref<256x256xf32, #tpu.memory_space<vmem>>, %arg8: memref<32x1xf32, #tpu.memory_space<vmem>>, %arg9: memref<2x8x256xf32, #tpu.memory_space<vmem>>, %arg10: memref<2x8x256xf32, #tpu.memory_space<vmem>>, %arg11: memref<24x256xf32, #tpu.memory_space<vmem>>) attributes {dimension_semantics = [#tpu.dimension_semantics<parallel>, #tpu.dimension_semantics<parallel>], iteration_bounds = array<i64: 1, 1>, scalar_prefetch = 0 : i64, scratch_operands = 1 : i64, tpu.core_type = #tpu.core_type<tc>, window_params = [{transform_indices = @transform_0, window_bounds = array<i64: 2, 4, 256>}, {transform_indices = @transform_1, window_bounds = array<i64: 2, 8, 256>}, {transform_indices = @transform_2, window_bounds = array<i64: 2, 8, 256>}, {transform_indices = @transform_3, window_bounds = array<i64: 2, 8, 256>}, {pipeline_mode = #tpu.pipeline_mode<synchronous>, transform_indices = @transform_4, window_bounds = array<i64: 32, 24>}, {transform_indices = @transform_5, window_bounds = array<i64: 256, 256>}, {pipeline_mode = #tpu.pipeline_mode<synchronous>, transform_indices = @transform_6, window_bounds = array<i64: 32, 1>}, {transform_indices = @transform_7, window_bounds = array<i64: 2, 8, 256>}, {transform_indices = @transform_8, window_bounds = array<i64: 2, 8, 256>}]} {
    %cst = arith.constant 0.000000e+00 : f32
    %0 = vector.broadcast %cst : f32 to vector<24x256xf32>
    %c0 = arith.constant 0 : index
    %c0_0 = arith.constant 0 : index
    %1 = vector.load %arg11[%c0, %c0_0] : memref<24x256xf32, #tpu.memory_space<vmem>>, vector<24x256xf32>
    tpu.vector_store %arg11[%c0, %c0_0], %0 {strides = array<i32>} : memref<24x256xf32, #tpu.memory_space<vmem>>, vector<24x256xf32>,
    %c0_1 = arith.constant 0 : index
    %c0_2 = arith.constant 0 : index
    %c0_3 = arith.constant 0 : index
    %2 = vector.load %arg3[%c0_1, %c0_2, %c0_3] : memref<2x8x256xf32, #tpu.memory_space<vmem>>, vector<1x8x256xf32>
    %3 = vector.shape_cast %2 : vector<1x8x256xf32> to vector<8x256xf32>
    %c0_4 = arith.constant 0 : index
    %c0_5 = arith.constant 0 : index
    %4 = vector.load %arg7[%c0_4, %c0_5] : memref<256x256xf32, #tpu.memory_space<vmem>>, vector<256x256xf32>
    %cst_6 = arith.constant dense<0.000000e+00> : vector<8x256xf32>
    %5 = tpu.matmul %3, %4, %cst_6 {dimension_numbers = #tpu.dot_dimension_numbers<[1], [0], [0], [1], [0, 0, 1, 1], [], []>} : vector<8x256xf32>, vector<256x256xf32>, vector<8x256xf32> -> vector<8x256xf32>
    %c0_7 = arith.constant 0 : index
    %c0_8 = arith.constant 0 : index
    %c0_9 = arith.constant 0 : index
    %6 = vector.load %arg2[%c0_7, %c0_8, %c0_9] : memref<2x4x256xf32, #tpu.memory_space<vmem>>, vector<1x4x256xf32>
    %7 = vector.shape_cast %6 : vector<1x4x256xf32> to vector<4x256xf32>
    %c0_10 = arith.constant 0 : index
    %c0_11 = arith.constant 0 : index
    %8 = vector.load %arg11[%c0_10, %c0_11] : memref<24x256xf32, #tpu.memory_space<vmem>>, vector<4x256xf32>
    tpu.vector_store %arg11[%c0_10, %c0_11], %7 {strides = array<i32>} : memref<24x256xf32, #tpu.memory_space<vmem>>, vector<4x256xf32>,
    %c0_12 = arith.constant 0 : index
    %c0_13 = arith.constant 0 : index
    %c0_14 = arith.constant 0 : index
    %9 = vector.load %arg4[%c0_12, %c0_13, %c0_14] : memref<2x8x256xf32, #tpu.memory_space<vmem>>, vector<1x8x256xf32>
    %10 = vector.shape_cast %9 : vector<1x8x256xf32> to vector<8x256xf32>
    %c8 = arith.constant 8 : index
    %c0_15 = arith.constant 0 : index
    %11 = vector.load %arg11[%c8, %c0_15] : memref<24x256xf32, #tpu.memory_space<vmem>>, vector<8x256xf32>
    tpu.vector_store %arg11[%c8, %c0_15], %10 {strides = array<i32>} : memref<24x256xf32, #tpu.memory_space<vmem>>, vector<8x256xf32>,
    %c16 = arith.constant 16 : index
    %c0_16 = arith.constant 0 : index
    %12 = vector.load %arg11[%c16, %c0_16] : memref<24x256xf32, #tpu.memory_space<vmem>>, vector<8x256xf32>
    tpu.vector_store %arg11[%c16, %c0_16], %5 {strides = array<i32>} : memref<24x256xf32, #tpu.memory_space<vmem>>, vector<8x256xf32>,
    %c0_17 = arith.constant 0 : index
    %c0_18 = arith.constant 0 : index
    %13 = vector.load %arg6[%c0_17, %c0_18] : memref<32x24xf32, #tpu.memory_space<vmem>>, vector<32x24xf32>
    %c0_19 = arith.constant 0 : index
    %c0_20 = arith.constant 0 : index
    %14 = vector.load %arg11[%c0_19, %c0_20] : memref<24x256xf32, #tpu.memory_space<vmem>>, vector<24x256xf32>
    %cst_21 = arith.constant dense<0.000000e+00> : vector<32x256xf32>
    %15 = tpu.matmul %13, %14, %cst_21 {dimension_numbers = #tpu.dot_dimension_numbers<[1], [0], [0], [1], [0, 0, 1, 1], [], []>} : vector<32x24xf32>, vector<24x256xf32>, vector<32x256xf32> -> vector<32x256xf32>
    %c0_22 = arith.constant 0 : index
    %c0_23 = arith.constant 0 : index
    %16 = vector.load %arg8[%c0_22, %c0_23] : memref<32x1xf32, #tpu.memory_space<vmem>>, vector<32x1xf32>
    %17 = vector.broadcast %16 : vector<32x1xf32> to vector<32x256xf32>
    %18 = arith.addf %15, %17 : vector<32x256xf32>
    %19 = vector.extract_strided_slice %18 {offsets = [0, 0], sizes = [8, 256], strides = [1, 1]} : vector<32x256xf32> to vector<8x256xf32>
    %20 = arith.negf %19 : vector<8x256xf32>
    %21 = math.exp %20 : vector<8x256xf32>
    %cst_24 = arith.constant 1.000000e+00 : f32
    %22 = vector.broadcast %cst_24 : f32 to vector<8x256xf32>
    %23 = arith.addf %22, %21 : vector<8x256xf32>
    %24 = arith.divf %22, %23 : vector<8x256xf32>
    %25 = vector.extract_strided_slice %18 {offsets = [8, 0], sizes = [8, 256], strides = [1, 1]} : vector<32x256xf32> to vector<8x256xf32>
    %26 = arith.negf %25 : vector<8x256xf32>
    %27 = math.exp %26 : vector<8x256xf32>
    %cst_25 = arith.constant 1.000000e+00 : f32
    %28 = vector.broadcast %cst_25 : f32 to vector<8x256xf32>
    %29 = arith.addf %28, %27 : vector<8x256xf32>
    %30 = arith.divf %28, %29 : vector<8x256xf32>
    %31 = vector.extract_strided_slice %18 {offsets = [16, 0], sizes = [8, 256], strides = [1, 1]} : vector<32x256xf32> to vector<8x256xf32>
    %32 = arith.negf %31 : vector<8x256xf32>
    %33 = math.exp %32 : vector<8x256xf32>
    %cst_26 = arith.constant 1.000000e+00 : f32
    %34 = vector.broadcast %cst_26 : f32 to vector<8x256xf32>
    %35 = arith.addf %34, %33 : vector<8x256xf32>
    %36 = arith.divf %34, %35 : vector<8x256xf32>
    %37 = vector.extract_strided_slice %18 {offsets = [24, 0], sizes = [8, 256], strides = [1, 1]} : vector<32x256xf32> to vector<8x256xf32>
    %38 = math.tanh %37 : vector<8x256xf32>
    %c0_27 = arith.constant 0 : index
    %c0_28 = arith.constant 0 : index
    %c0_29 = arith.constant 0 : index
    %39 = vector.load %arg5[%c0_27, %c0_28, %c0_29] : memref<2x8x256xf32, #tpu.memory_space<vmem>>, vector<1x8x256xf32>
    %40 = vector.shape_cast %39 : vector<1x8x256xf32> to vector<8x256xf32>
    %41 = arith.mulf %40, %30 : vector<8x256xf32>
    %42 = arith.mulf %38, %24 : vector<8x256xf32>
    %43 = arith.addf %41, %42 : vector<8x256xf32>
    %44 = math.tanh %43 : vector<8x256xf32>
    %45 = arith.mulf %36, %44 : vector<8x256xf32>
    %c0_30 = arith.constant 0 : index
    %c0_31 = arith.constant 0 : index
    %c0_32 = arith.constant 0 : index
    %46 = vector.load %arg9[%c0_30, %c0_31, %c0_32] : memref<2x8x256xf32, #tpu.memory_space<vmem>>, vector<1x8x256xf32>
    %47 = vector.shape_cast %46 : vector<1x8x256xf32> to vector<8x256xf32>
    %48 = vector.shape_cast %45 : vector<8x256xf32> to vector<1x8x256xf32>
    tpu.vector_store %arg9[%c0_30, %c0_31, %c0_32], %48 {strides = array<i32>} : memref<2x8x256xf32, #tpu.memory_space<vmem>>, vector<1x8x256xf32>,
    %c0_33 = arith.constant 0 : index
    %c0_34 = arith.constant 0 : index
    %c0_35 = arith.constant 0 : index
    %49 = vector.load %arg10[%c0_33, %c0_34, %c0_35] : memref<2x8x256xf32, #tpu.memory_space<vmem>>, vector<1x8x256xf32>
    %50 = vector.shape_cast %49 : vector<1x8x256xf32> to vector<8x256xf32>
    %51 = vector.shape_cast %43 : vector<8x256xf32> to vector<1x8x256xf32>
    tpu.vector_store %arg10[%c0_33, %c0_34, %c0_35], %51 {strides = array<i32>} : memref<2x8x256xf32, #tpu.memory_space<vmem>>, vector<1x8x256xf32>,
    %c1 = arith.constant 1 : index
    %c0_36 = arith.constant 0 : index
    %c0_37 = arith.constant 0 : index
    %52 = vector.load %arg3[%c1, %c0_36, %c0_37] : memref<2x8x256xf32, #tpu.memory_space<vmem>>, vector<1x8x256xf32>
    %53 = vector.shape_cast %52 : vector<1x8x256xf32> to vector<8x256xf32>
    %c0_38 = arith.constant 0 : index
    %c0_39 = arith.constant 0 : index
    %54 = vector.load %arg7[%c0_38, %c0_39] : memref<256x256xf32, #tpu.memory_space<vmem>>, vector<256x256xf32>
    %cst_40 = arith.constant dense<0.000000e+00> : vector<8x256xf32>
    %55 = tpu.matmul %53, %54, %cst_40 {dimension_numbers = #tpu.dot_dimension_numbers<[1], [0], [0], [1], [0, 0, 1, 1], [], []>} : vector<8x256xf32>, vector<256x256xf32>, vector<8x256xf32> -> vector<8x256xf32>
    %c1_41 = arith.constant 1 : index
    %c0_42 = arith.constant 0 : index
    %c0_43 = arith.constant 0 : index
    %56 = vector.load %arg2[%c1_41, %c0_42, %c0_43] : memref<2x4x256xf32, #tpu.memory_space<vmem>>, vector<1x4x256xf32>
    %57 = vector.shape_cast %56 : vector<1x4x256xf32> to vector<4x256xf32>
    %c0_44 = arith.constant 0 : index
    %c0_45 = arith.constant 0 : index
    %58 = vector.load %arg11[%c0_44, %c0_45] : memref<24x256xf32, #tpu.memory_space<vmem>>, vector<4x256xf32>
    tpu.vector_store %arg11[%c0_44, %c0_45], %57 {strides = array<i32>} : memref<24x256xf32, #tpu.memory_space<vmem>>, vector<4x256xf32>,
    %c1_46 = arith.constant 1 : index
    %c0_47 = arith.constant 0 : index
    %c0_48 = arith.constant 0 : index
    %59 = vector.load %arg4[%c1_46, %c0_47, %c0_48] : memref<2x8x256xf32, #tpu.memory_space<vmem>>, vector<1x8x256xf32>
    %60 = vector.shape_cast %59 : vector<1x8x256xf32> to vector<8x256xf32>
    %c8_49 = arith.constant 8 : index
    %c0_50 = arith.constant 0 : index
    %61 = vector.load %arg11[%c8_49, %c0_50] : memref<24x256xf32, #tpu.memory_space<vmem>>, vector<8x256xf32>
    tpu.vector_store %arg11[%c8_49, %c0_50], %60 {strides = array<i32>} : memref<24x256xf32, #tpu.memory_space<vmem>>, vector<8x256xf32>,
    %c16_51 = arith.constant 16 : index
    %c0_52 = arith.constant 0 : index
    %62 = vector.load %arg11[%c16_51, %c0_52] : memref<24x256xf32, #tpu.memory_space<vmem>>, vector<8x256xf32>
    tpu.vector_store %arg11[%c16_51, %c0_52], %55 {strides = array<i32>} : memref<24x256xf32, #tpu.memory_space<vmem>>, vector<8x256xf32>,
    %c0_53 = arith.constant 0 : index
    %c0_54 = arith.constant 0 : index
    %63 = vector.load %arg6[%c0_53, %c0_54] : memref<32x24xf32, #tpu.memory_space<vmem>>, vector<32x24xf32>
    %c0_55 = arith.constant 0 : index
    %c0_56 = arith.constant 0 : index
    %64 = vector.load %arg11[%c0_55, %c0_56] : memref<24x256xf32, #tpu.memory_space<vmem>>, vector<24x256xf32>
    %cst_57 = arith.constant dense<0.000000e+00> : vector<32x256xf32>
    %65 = tpu.matmul %63, %64, %cst_57 {dimension_numbers = #tpu.dot_dimension_numbers<[1], [0], [0], [1], [0, 0, 1, 1], [], []>} : vector<32x24xf32>, vector<24x256xf32>, vector<32x256xf32> -> vector<32x256xf32>
    %c0_58 = arith.constant 0 : index
    %c0_59 = arith.constant 0 : index
    %66 = vector.load %arg8[%c0_58, %c0_59] : memref<32x1xf32, #tpu.memory_space<vmem>>, vector<32x1xf32>
    %67 = vector.broadcast %66 : vector<32x1xf32> to vector<32x256xf32>
    %68 = arith.addf %65, %67 : vector<32x256xf32>
    %69 = vector.extract_strided_slice %68 {offsets = [0, 0], sizes = [8, 256], strides = [1, 1]} : vector<32x256xf32> to vector<8x256xf32>
    %70 = arith.negf %69 : vector<8x256xf32>
    %71 = math.exp %70 : vector<8x256xf32>
    %cst_60 = arith.constant 1.000000e+00 : f32
    %72 = vector.broadcast %cst_60 : f32 to vector<8x256xf32>
    %73 = arith.addf %72, %71 : vector<8x256xf32>
    %74 = arith.divf %72, %73 : vector<8x256xf32>
    %75 = vector.extract_strided_slice %68 {offsets = [8, 0], sizes = [8, 256], strides = [1, 1]} : vector<32x256xf32> to vector<8x256xf32>
    %76 = arith.negf %75 : vector<8x256xf32>
    %77 = math.exp %76 : vector<8x256xf32>
    %cst_61 = arith.constant 1.000000e+00 : f32
    %78 = vector.broadcast %cst_61 : f32 to vector<8x256xf32>
    %79 = arith.addf %78, %77 : vector<8x256xf32>
    %80 = arith.divf %78, %79 : vector<8x256xf32>
    %81 = vector.extract_strided_slice %68 {offsets = [16, 0], sizes = [8, 256], strides = [1, 1]} : vector<32x256xf32> to vector<8x256xf32>
    %82 = arith.negf %81 : vector<8x256xf32>
    %83 = math.exp %82 : vector<8x256xf32>
    %cst_62 = arith.constant 1.000000e+00 : f32
    %84 = vector.broadcast %cst_62 : f32 to vector<8x256xf32>
    %85 = arith.addf %84, %83 : vector<8x256xf32>
    %86 = arith.divf %84, %85 : vector<8x256xf32>
    %87 = vector.extract_strided_slice %68 {offsets = [24, 0], sizes = [8, 256], strides = [1, 1]} : vector<32x256xf32> to vector<8x256xf32>
    %88 = math.tanh %87 : vector<8x256xf32>
    %c1_63 = arith.constant 1 : index
    %c0_64 = arith.constant 0 : index
    %c0_65 = arith.constant 0 : index
    %89 = vector.load %arg5[%c1_63, %c0_64, %c0_65] : memref<2x8x256xf32, #tpu.memory_space<vmem>>, vector<1x8x256xf32>
    %90 = vector.shape_cast %89 : vector<1x8x256xf32> to vector<8x256xf32>
    %91 = arith.mulf %90, %80 : vector<8x256xf32>
    %92 = arith.mulf %88, %74 : vector<8x256xf32>
    %93 = arith.addf %91, %92 : vector<8x256xf32>
    %94 = math.tanh %93 : vector<8x256xf32>
    %95 = arith.mulf %86, %94 : vector<8x256xf32>
    %c1_66 = arith.constant 1 : index
    %c0_67 = arith.constant 0 : index
    %c0_68 = arith.constant 0 : index
    %96 = vector.load %arg9[%c1_66, %c0_67, %c0_68] : memref<2x8x256xf32, #tpu.memory_space<vmem>>, vector<1x8x256xf32>
    %97 = vector.shape_cast %96 : vector<1x8x256xf32> to vector<8x256xf32>
    %98 = vector.shape_cast %95 : vector<8x256xf32> to vector<1x8x256xf32>
    tpu.vector_store %arg9[%c1_66, %c0_67, %c0_68], %98 {strides = array<i32>} : memref<2x8x256xf32, #tpu.memory_space<vmem>>, vector<1x8x256xf32>,
    %c1_69 = arith.constant 1 : index
    %c0_70 = arith.constant 0 : index
    %c0_71 = arith.constant 0 : index
    %99 = vector.load %arg10[%c1_69, %c0_70, %c0_71] : memref<2x8x256xf32, #tpu.memory_space<vmem>>, vector<1x8x256xf32>
    %100 = vector.shape_cast %99 : vector<1x8x256xf32> to vector<8x256xf32>
    %101 = vector.shape_cast %93 : vector<8x256xf32> to vector<1x8x256xf32>
    tpu.vector_store %arg10[%c1_69, %c0_70, %c0_71], %101 {strides = array<i32>} : memref<2x8x256xf32, #tpu.memory_space<vmem>>, vector<1x8x256xf32>,
    return
  }
  func.func @transform_0(%arg0: i32, %arg1: i32) -> (i32, i32, i32) {
    %c0_i32 = arith.constant 0 : i32
    %c0_i32_0 = arith.constant 0 : i32
    return %arg0, %c0_i32, %arg1 : i32, i32, i32
  }
  func.func @transform_1(%arg0: i32, %arg1: i32) -> (i32, i32, i32) {
    %c0_i32 = arith.constant 0 : i32
    %c0_i32_0 = arith.constant 0 : i32
    %c0_i32_1 = arith.constant 0 : i32
    return %arg0, %c0_i32, %c0_i32_0 : i32, i32, i32
  }
  func.func @transform_2(%arg0: i32, %arg1: i32) -> (i32, i32, i32) {
    %c0_i32 = arith.constant 0 : i32
    %c0_i32_0 = arith.constant 0 : i32
    return %arg0, %c0_i32, %arg1 : i32, i32, i32
  }
  func.func @transform_3(%arg0: i32, %arg1: i32) -> (i32, i32, i32) {
    %c0_i32 = arith.constant 0 : i32
    %c0_i32_0 = arith.constant 0 : i32
    return %arg0, %c0_i32, %arg1 : i32, i32, i32
  }
  func.func @transform_4(%arg0: i32, %arg1: i32) -> (i32, i32) {
    %c0_i32 = arith.constant 0 : i32
    %c0_i32_0 = arith.constant 0 : i32
    %c0_i32_1 = arith.constant 0 : i32
    return %c0_i32, %c0_i32_0 : i32, i32
  }
  func.func @transform_5(%arg0: i32, %arg1: i32) -> (i32, i32) {
    %c0_i32 = arith.constant 0 : i32
    %c0_i32_0 = arith.constant 0 : i32
    return %c0_i32, %arg1 : i32, i32
  }
  func.func @transform_6(%arg0: i32, %arg1: i32) -> (i32, i32) {
    %c0_i32 = arith.constant 0 : i32
    %c0_i32_0 = arith.constant 0 : i32
    %c0_i32_1 = arith.constant 0 : i32
    return %c0_i32, %c0_i32_0 : i32, i32
  }
  func.func @transform_7(%arg0: i32, %arg1: i32) -> (i32, i32, i32) {
    %c0_i32 = arith.constant 0 : i32
    %c0_i32_0 = arith.constant 0 : i32
    return %arg0, %c0_i32, %arg1 : i32, i32, i32
  }
  func.func @transform_8(%arg0: i32, %arg1: i32) -> (i32, i32, i32) {
    %c0_i32 = arith.constant 0 : i32
    %c0_i32_0 = arith.constant 0 : i32
    return %arg0, %c0_i32, %arg1 : i32, i32, i32
  }
}

</mosaic_0001>

<bundles_post_ra>
// kernel: tpu_custom_call.1
= control target key start
LH: loop header
LB: loop body
LE: loop exit
PB: predicated region body
PF: predicated region fallthrough
CT: control target
= control target key end

     0   :  { %14 = vsyncpa [#allocation4], 0  ;;  %s1682_s0 = inlined_call_operand.vmem [shape: f32[2,4,256], index: 0, kind: input, shape index: {}]   ;;  %s1683_s1 = inlined_call_operand.vmem [shape: f32[2,8,256], index: 1, kind: input, shape index: {}]   ;;  %s1684_s2 = inlined_call_operand.vmem [shape: f32[2,8,256], index: 2, kind: input, shape index: {}]   ;;  %s1685_s3 = inlined_call_operand.hbm [shape: f32[2,8,256], index: 3, kind: input, shape index: {}]   ;;  %s1686_s4 = inlined_call_operand.vmem [shape: f32[32,24], index: 4, kind: input, shape index: {}]   ;;  %s1687_s5 = inlined_call_operand.hbm [shape: f32[256,256], index: 5, kind: input, shape index: {}]   ;;  %s1688_s6 = inlined_call_operand.vmem [shape: f32[32,1], index: 6, kind: input, shape index: {}]   ;;  %s1689_s7 = inlined_call_operand.hbm [shape: f32[2,8,256], index: 7, kind: output, shape index: {0}]   ;;  %s1690_s8 = inlined_call_operand.hbm [shape: f32[2,8,256], index: 8, kind: output, shape index: {1}]  }
   0x1   :  { %15 = vsyncpa [#allocation7], 0 }
   0x2   :  { %16 = vsyncpa [#allocation5], 0 }
   0x3   :  { %17 = vsyncpa [#allocation10], 0  ;;  %s28_s29 = sshll.u32 %s1685_s3, 4  ;;  %s1125_s30 = smov [#allocation3]   ;;  %s29_s29 = int_to_ptr.hbm [resolvable:$true] %s28_s29 }
   0x4   :  { %s30_s9 = sshll.u32 %s1125_s30, 4  ;;  %s43_s12 = sshll.u32 %s1687_s5, 4  ;;  %s31_s9 = int_to_ptr.vmem [resolvable:$true] %s30_s9  ;;  %s44_s12 = int_to_ptr.hbm [resolvable:$true] %s43_s12 }
   0x5   :  { %s1126_s13 = smov 256   ;;  %s1127_s14 = smov 16  }
   0x6   :  { %36 = dma.hbm_to_vmem [thread:$0]  %s29_s29, 512, %s31_s9, [#allocation4], %s1126_s13, %s1126_s13, %s1127_s14  }
   0x7   :  { %s1128_s15 = smov [#allocation6]  }
   0x8   :  { %s45_s16 = sshll.u32 %s1128_s15, 4  ;;  %s46_s16 = int_to_ptr.vmem [resolvable:$true] %s45_s16 }
   0x9   :  { %51 = dma.hbm_to_vmem [thread:$0]  %s44_s12, 8192, %s46_s16, [#allocation7], %s1126_s13, %s1126_s13, %s1127_s14  }
   0xa   :  { %1117 = dma.done.wait [#allocation4], 512  }
   0xb   :  { %1118 = vsyncadd [#allocation4], 4294966784 }
   0xc   :  { %1119 = dma.done.wait [#allocation7], 8192  }
   0xd   :  { %1120 = vsyncadd [#allocation7], 4294959104  ;;  %v1190_v0 = vld [vmem:[#allocation6 + $0xf0] sm:$0xff]  ;;  %v1194_v2 = vld [vmem:[#allocation6 + $0xf8] sm:$0xff]  ;;  %vm263_vm0 = vcmask 195584   ;;  %s888_s28 = sshll.u32 %s1690_s8, 4  ;;  %s889_s28 = int_to_ptr.hbm [resolvable:$true] %s888_s28 }
   0xe   :  { %v1192_v1 = vld [vmem:[#allocation6 + $0x1f0] sm:$0xff]  ;;  %134 = vmatpush.msra.mxu0 %v1190_v0  ;;  %v1198_v3 = vld [vmem:[#allocation6 + $0x1f8] sm:$0xff]  ;;  %v1200_v4 = vld [vmem:[#allocation6 + $0xe0] sm:$0xff]  ;;  %174 = vmatpush.msra.mxu2 %v1194_v2  ;;  %s1132_s8 = smov [#allocation8]   ;;  %s875_s9 = sshll.u32 %s1689_s7, 4  ;;  %s876_s9 = int_to_ptr.hbm [resolvable:$true] %s875_s9 }
   0xf   :  { %154 = vmatpush.msra.mxu1 %v1192_v1  ;;  %v1202_v5 = vld [vmem:[#allocation6 + $0x1e0] sm:$0xff]  ;;  %194 = vmatpush.msra.mxu3 %v1198_v3  ;;  %v1206_v6 = vld [vmem:[#allocation6 + $0xe8] sm:$0xff]  ;;  %v1210_v8 = vld [vmem:[#allocation6 + $0xd0] sm:$0xff]  ;;  %s873_s29 = sshll.u32 %s1132_s8, 4  ;;  %s874_s29 = int_to_ptr.vmem [resolvable:$true] %s873_s29 }
  0x10   :  { %v1208_v7 = vld [vmem:[#allocation6 + $0x1e8] sm:$0xff]  ;;  %135 = vmatpush.msra.mxu0 %v1200_v4  ;;  %v1214_v9 = vld [vmem:[#allocation6 + $0x1d0] sm:$0xff]  ;;  %v1216_v10 = vld [vmem:[#allocation6 + $0xd8] sm:$0xff]  ;;  %175 = vmatpush.msra.mxu2 %v1206_v6 }
  0x11   :  { %155 = vmatpush.msra.mxu1 %v1202_v5  ;;  %v1218_v11 = vld [vmem:[#allocation6 + $0x1d8] sm:$0xff]  ;;  %195 = vmatpush.msra.mxu3 %v1208_v7  ;;  %v1222_v12 = vld [vmem:[#allocation6 + $0xc0] sm:$0xff]  ;;  %v1228_v14 = vld [vmem:[#allocation6 + $0xc8] sm:$0xff] }
  0x12   :  { %v1224_v13 = vld [vmem:[#allocation6 + $0x1c0] sm:$0xff]  ;;  %136 = vmatpush.msra.mxu0 %v1210_v8  ;;  %v1230_v15 = vld [vmem:[#allocation6 + $0x1c8] sm:$0xff]  ;;  %176 = vmatpush.msra.mxu2 %v1216_v10  ;;  %v1234_v16 = vld [vmem:[#allocation6 + $0xb0] sm:$0xff] }
  0x13   :  { %156 = vmatpush.msra.mxu1 %v1214_v9  ;;  %196 = vmatpush.msra.mxu3 %v1218_v11  ;;  %v1236_v17 = vld [vmem:[#allocation6 + $0x1b0] sm:$0xff]  ;;  %v1240_v18 = vld [vmem:[#allocation6 + $0xb8] sm:$0xff]  ;;  %v1246_v20 = vld [vmem:[#allocation6 + $0xa0] sm:$0xff] }
  0x14   :  { %137 = vmatpush.msra.mxu0 %v1222_v12  ;;  %v1242_v19 = vld [vmem:[#allocation6 + $0x1b8] sm:$0xff]  ;;  %177 = vmatpush.msra.mxu2 %v1228_v14  ;;  %v1248_v21 = vld [vmem:[#allocation6 + $0x1a0] sm:$0xff]  ;;  %v1252_v22 = vld [vmem:[#allocation6 + $0xa8] sm:$0xff] }
  0x15   :  { %157 = vmatpush.msra.mxu1 %v1224_v13  ;;  %197 = vmatpush.msra.mxu3 %v1230_v15  ;;  %v1254_v23 = vld [vmem:[#allocation6 + $0x1a8] sm:$0xff]  ;;  %v1258_v24 = vld [vmem:[#allocation6 + $0x90] sm:$0xff]  ;;  %v1264_v26 = vld [vmem:[#allocation6 + $0x98] sm:$0xff] }
  0x16   :  { %138 = vmatpush.msra.mxu0 %v1234_v16  ;;  %178 = vmatpush.msra.mxu2 %v1240_v18  ;;  %v1260_v25 = vld [vmem:[#allocation6 + $0x190] sm:$0xff]  ;;  %v1266_v27 = vld [vmem:[#allocation6 + $0x198] sm:$0xff]  ;;  %v1270_v28 = vld [vmem:[#allocation6 + $0x80] sm:$0xff] }
  0x17   :  { %158 = vmatpush.msra.mxu1 %v1236_v17  ;;  %198 = vmatpush.msra.mxu3 %v1242_v19  ;;  %v1272_v29 = vld [vmem:[#allocation6 + $0x180] sm:$0xff]  ;;  %v1276_v30 = vld [vmem:[#allocation6 + $0x88] sm:$0xff]  ;;  %v1282_v32 = vld [vmem:[#allocation6 + $0x70] sm:$0xff] }
  0x18   :  { %139 = vmatpush.msra.mxu0 %v1246_v20  ;;  %179 = vmatpush.msra.mxu2 %v1252_v22  ;;  %v1278_v31 = vld [vmem:[#allocation6 + $0x188] sm:$0xff]  ;;  %v1284_v33 = vld [vmem:[#allocation6 + $0x170] sm:$0xff]  ;;  %v1288_v34 = vld [vmem:[#allocation6 + $0x78] sm:$0xff] }
  0x19   :  { %159 = vmatpush.msra.mxu1 %v1248_v21  ;;  %199 = vmatpush.msra.mxu3 %v1254_v23  ;;  %v1290_v35 = vld [vmem:[#allocation6 + $0x178] sm:$0xff]  ;;  %v1294_v36 = vld [vmem:[#allocation6 + $0x60] sm:$0xff]  ;;  %v1300_v38 = vld [vmem:[#allocation6 + $0x68] sm:$0xff] }
  0x1a   :  { %140 = vmatpush.msra.mxu0 %v1258_v24  ;;  %180 = vmatpush.msra.mxu2 %v1264_v26  ;;  %v1296_v37 = vld [vmem:[#allocation6 + $0x160] sm:$0xff]  ;;  %v1302_v39 = vld [vmem:[#allocation6 + $0x168] sm:$0xff]  ;;  %v1306_v40 = vld [vmem:[#allocation6 + $0x50] sm:$0xff] }
  0x1b   :  { %160 = vmatpush.msra.mxu1 %v1260_v25  ;;  %200 = vmatpush.msra.mxu3 %v1266_v27  ;;  %v1308_v41 = vld [vmem:[#allocation6 + $0x150] sm:$0xff]  ;;  %v1312_v42 = vld [vmem:[#allocation6 + $0x58] sm:$0xff]  ;;  %v1318_v44 = vld [vmem:[#allocation6 + $0x40] sm:$0xff] }
  0x1c   :  { %141 = vmatpush.msra.mxu0 %v1270_v28  ;;  %181 = vmatpush.msra.mxu2 %v1276_v30  ;;  %v1314_v43 = vld [vmem:[#allocation6 + $0x158] sm:$0xff]  ;;  %v1320_v45 = vld [vmem:[#allocation6 + $0x140] sm:$0xff]  ;;  %v1324_v46 = vld [vmem:[#allocation6 + $0x48] sm:$0xff] }
  0x1d   :  { %161 = vmatpush.msra.mxu1 %v1272_v29  ;;  %201 = vmatpush.msra.mxu3 %v1278_v31  ;;  %v1326_v47 = vld [vmem:[#allocation6 + $0x148] sm:$0xff]  ;;  %v1330_v48 = vld [vmem:[#allocation6 + $0x30] sm:$0xff]  ;;  %v1336_v50 = vld [vmem:[#allocation6 + $0x38] sm:$0xff] }
  0x1e   :  { %142 = vmatpush.msra.mxu0 %v1282_v32  ;;  %182 = vmatpush.msra.mxu2 %v1288_v34  ;;  %v1332_v49 = vld [vmem:[#allocation6 + $0x130] sm:$0xff]  ;;  %v1338_v51 = vld [vmem:[#allocation6 + $0x138] sm:$0xff]  ;;  %v74_v52 = vld [vmem:[#allocation6 + $0x20] sm:$0xff] }
  0x1f   :  { %162 = vmatpush.msra.mxu1 %v1284_v33  ;;  %202 = vmatpush.msra.mxu3 %v1290_v35  ;;  %1693 = vst [vmem:[#allocation15_spill] sm:$0xff] %v1338_v51  ;;  %v106_v53 = vld [vmem:[#allocation6 + $0x120] sm:$0xff]  ;;  %v1344_v54 = vld [vmem:[#allocation6 + $0x28] sm:$0xff]  ;;  %v72_v56 = vld [vmem:[#allocation6 + $0x10] sm:$0xff] }
  0x20   :  { %143 = vmatpush.msra.mxu0 %v1294_v36  ;;  %183 = vmatpush.msra.mxu2 %v1300_v38  ;;  %v1346_v55 = vld [vmem:[#allocation6 + $0x128] sm:$0xff]  ;;  %v104_v57 = vld [vmem:[#allocation6 + $0x110] sm:$0xff]  ;;  %v1350_v58 = vld [vmem:[#allocation6 + $0x18] sm:$0xff] }
  0x21   :  { %163 = vmatpush.msra.mxu1 %v1296_v37  ;;  %203 = vmatpush.msra.mxu3 %v1302_v39  ;;  %1694 = vst [vmem:[#allocation16_spill] sm:$0xff] %v1346_v55  ;;  %v1352_v59 = vld [vmem:[#allocation6 + $0x118] sm:$0xff]  ;;  %v70_v60 = vld [vmem:[#allocation6] sm:$0xff]  ;;  %v1356_v62 = vld [vmem:[#allocation6 + $0x8] sm:$0xff] }
  0x22   :  { %144 = vmatpush.msra.mxu0 %v1306_v40  ;;  %184 = vmatpush.msra.mxu2 %v1312_v42  ;;  %v102_v61 = vld [vmem:[#allocation6 + $0x100] sm:$0xff]  ;;  %v1358_v63 = vld [vmem:[#allocation6 + $0x108] sm:$0xff] }
  0x23   :  { %164 = vmatpush.msra.mxu1 %v1308_v41  ;;  %204 = vmatpush.msra.mxu3 %v1314_v43 }
  0x24   :  { %145 = vmatpush.msra.mxu0 %v1318_v44  ;;  %185 = vmatpush.msra.mxu2 %v1324_v46 }
  0x25   :  { %165 = vmatpush.msra.mxu1 %v1320_v45  ;;  %205 = vmatpush.msra.mxu3 %v1326_v47 }
  0x26   :  { %146 = vmatpush.msra.mxu0 %v1330_v48  ;;  %186 = vmatpush.msra.mxu2 %v1336_v50 }
  0x27   :  { %166 = vmatpush.msra.mxu1 %v1332_v49  ;;  %206 = vmatpush.msra.mxu3 %v1338_v51  ;;  %v68_v51 = vld [vmem:[%s1683_s1] sm:$0xff] }
  0x28   :  { %147 = vmatpush.msra.mxu0 %v74_v52  ;;  %187 = vmatpush.msra.mxu2 %v1344_v54 }
  0x29   :  { %167 = vmatpush.msra.mxu1 %v106_v53  ;;  %207 = vmatpush.msra.mxu3 %v1346_v55  ;;  %v69_v55 = vld [vmem:[%s1683_s1 + $0x8] sm:$0xff] }
  0x2a   :  { %148 = vmatpush.msra.mxu0 %v72_v56  ;;  %188 = vmatpush.msra.mxu2 %v1350_v58 }
  0x2b   :  { %168 = vmatpush.msra.mxu1 %v104_v57  ;;  %208 = vmatpush.msra.mxu3 %v1352_v59 }
  0x2c   :  { %149 = vmatpush.msra.mxu0 %v70_v60  ;;  %189 = vmatpush.msra.mxu2 %v1356_v62 }
  0x2d   :  { %169 = vmatpush.msra.mxu1 %v102_v61  ;;  %209 = vmatpush.msra.mxu3 %v1358_v63 }
  0x2e   :  { %150 = vmatmul.f32.vlgmr.msra.gmra.mxu0 %v68_v51  ;;  %170 = vmatmul.f32.vlgmr.msra.gmra.mxu1 %v69_v55 }
  0x2f   :  { %190 = vmatmul.f32.vlgmr.msra.gmra.mxu2 %v68_v51  ;;  %210 = vmatmul.f32.vlgmr.msra.gmra.mxu3 %v69_v55  ;;  %v1451_v51 = vld [vmem:[%s1686_s4 + $0x8] sm:$0xff] }
  0x30   :  { %533 = vmatpush.msrb.mxu2 %v1190_v0  ;;  %553 = vmatpush.msrb.mxu3 %v1192_v1  ;;  %v214_v0 = vld [vmem:[%s1682_s0] sm:$0xff]  ;;  %v1129_v1 = vmov 0.0  }
  0x31   :  { %216 = vst [vmem:[#allocation1] ss:$2 sm:$0xff] %v214_v0 }
  0x32   :  { %534 = vmatpush.msrb.mxu2 %v1200_v4  ;;  %554 = vmatpush.msrb.mxu3 %v1202_v5  ;;  %62 = vst [vmem:[#allocation2 + $0x28] sm:$0xff] %v1129_v1 }
  0x33   :  { %63 = vst [vmem:[#allocation2 + $0x10] sm:$0xff] %v1129_v1 }
  0x34   :  { %535 = vmatpush.msrb.mxu2 %v1210_v8  ;;  %555 = vmatpush.msrb.mxu3 %v1214_v9  ;;  %v1402_v8 = vld [vmem:[%s1684_s2 + $0x10] sm:$0xff]  ;;  %v923_v9 = vld [vmem:[%s1682_s0 + $0x8] sm:$0xff] }
  0x36   :  { %536 = vmatpush.msrb.mxu2 %v1222_v12  ;;  %556 = vmatpush.msrb.mxu3 %v1224_v13  ;;  %v1410_v12 = vld [vmem:[%s1683_s1 + $0x10] sm:$0xff]  ;;  %v1415_v13 = vld [vmem:[%s1683_s1 + $0x18] sm:$0xff] }
  0x38   :  { %537 = vmatpush.msrb.mxu2 %v1234_v16  ;;  %557 = vmatpush.msrb.mxu3 %v1236_v17  ;;  %v217_v4 = vld.sshfl [vmem:[#allocation1] sm:$0xff pattern:$0x75316420]  ;;  %v218_v5 = vld.sshfl [vmem:[#allocation1 + $0x8] sm:$0xff pattern:$0x75316420] }
  0x39   :  { %221 = vst [vmem:[#allocation2 + $0x28] sm:$0xf] %v217_v4  ;;  %v1420_v16 = vld [vmem:[%s1684_s2 + $0x18] sm:$0xff] }
  0x3a   :  { %538 = vmatpush.msrb.mxu2 %v1246_v20  ;;  %558 = vmatpush.msrb.mxu3 %v1248_v21  ;;  %222 = vst [vmem:[#allocation2 + $0x10] sm:$0xf] %v218_v5 }
  0x3b   :  { %616 = vst [vmem:[#allocation1] ss:$2 sm:$0xff] %v923_v9 }
  0x3c   :  { %539 = vmatpush.msrb.mxu2 %v1258_v24  ;;  %559 = vmatpush.msrb.mxu3 %v1260_v25  ;;  %v239_v25 = vld [vmem:[%s1688_s6] sm:$0xff] }
  0x3e   :  { %540 = vmatpush.msrb.mxu2 %v1270_v28  ;;  %560 = vmatpush.msrb.mxu3 %v1272_v29  ;;  %v1130_v28 = vmov 0   ;;  %v240_v29 = vld [vmem:[%s1688_s6 + $0x8] sm:$0xff] }
  0x3f   :  { %954 = vset.pattern.permute.xlu0 %v1130_v28  ;;  %956 = vset.pattern.permute.xlu2 %v1130_v28 }
  0x40   :  { %541 = vmatpush.msrb.mxu2 %v1282_v32  ;;  %561 = vmatpush.msrb.mxu3 %v1284_v33  ;;  %v233_v17 = vld [vmem:[#allocation2 + $0x28] sm:$0xff] }
  0x41   :  { %v234_v24 = vld [vmem:[#allocation2 + $0x10] sm:$0xff]  ;;  %245 = vperm.xlu0 %954, %v239_v25   ;;  %955 = vset.pattern.permute.xlu1 %v1130_v28 }
  0x42   :  { %542 = vmatpush.msrb.mxu2 %v1294_v36  ;;  %562 = vmatpush.msrb.mxu3 %v1296_v37  ;;  %v617_v20 = vld.sshfl [vmem:[#allocation1] sm:$0xff pattern:$0x75316420]  ;;  %v618_v21 = vld.sshfl [vmem:[#allocation1 + $0x8] sm:$0xff pattern:$0x75316420] }
  0x43   :  { %621 = vst [vmem:[#allocation2 + $0x28] sm:$0xf] %v617_v20  ;;  %646 = vperm.xlu1 %955, %v239_v25   ;;  %v223_v37 = vld [vmem:[%s1684_s2] sm:$0xff] }
  0x44   :  { %543 = vmatpush.msrb.mxu2 %v1306_v40  ;;  %563 = vmatpush.msrb.mxu3 %v1308_v41  ;;  %622 = vst [vmem:[#allocation2 + $0x10] sm:$0xf] %v618_v21  ;;  %v1436_v40 = vld [vmem:[%s1686_s4] sm:$0xff] }
  0x46   :  { %544 = vmatpush.msrb.mxu2 %v1318_v44  ;;  %564 = vmatpush.msrb.mxu3 %v1320_v45 }
  0x48   :  { %545 = vmatpush.msrb.mxu2 %v1330_v48  ;;  %565 = vmatpush.msrb.mxu3 %v1332_v49  ;;  %v224_v48 = vld [vmem:[%s1684_s2 + $0x8] sm:$0xff]  ;;  %v242_v49 = vld [vmem:[%s1688_s6 + $0x18] sm:$0xff] }
  0x49   :  { %250 = vperm.xlu0 %954, %v240_v29  }
  0x4a   :  { %546 = vmatpush.msrb.mxu2 %v74_v52  ;;  %566 = vmatpush.msrb.mxu3 %v106_v53 }
  0x4b   :  { %651 = vperm.xlu1 %955, %v240_v29  }
  0x4c   :  { %547 = vmatpush.msrb.mxu2 %v72_v56  ;;  %567 = vmatpush.msrb.mxu3 %v104_v57 }
  0x4e   :  { %548 = vmatpush.msrb.mxu2 %v70_v60  ;;  %568 = vmatpush.msrb.mxu3 %v102_v61 }
  0x4f   :  { %549 = vmatmul.f32.vlgmr.msrb.gmra.mxu2 %v1410_v12  ;;  %569 = vmatmul.f32.vlgmr.msrb.gmra.mxu3 %v1415_v13 }
  0x51   :  { %260 = vperm.xlu0 %954, %v242_v49  }
  0x53   :  { %661 = vperm.xlu1 %955, %v242_v49  }
  0xab   :  { %v151_v32 = vpop.f32.mrf.mxu0  ;;  %v171_v33 = vpop.f32.mrf.mxu1 }
  0xac   :  { %v172_v36 = vadd.f32 %v171_v33, %v151_v32 }
  0xae   :  { %289 = vmatpush.msrb.mxu0 %v172_v36 }
  0xb0   :  { %290 = vmatpush.msrb.mxu0 %v223_v37 }
  0xb2   :  { %v191_v41 = vpop.f32.mrf.mxu2  ;;  %v211_v44 = vpop.f32.mrf.mxu3  ;;  %291 = vmatpush.msrb.mxu0 %v233_v17 }
  0xb3   :  { %v212_v45 = vadd.f32 %v211_v44, %v191_v41  ;;  %907 = vmatmul.msk.f32.vlgmr.msrb.gmra.mxu0 %vm263_vm0, %v1436_v40 }
  0xb4   :  { %573 = vmatpush.msra.mxu0 %v1194_v2  ;;  %v241_v2 = vld [vmem:[%s1688_s6 + $0x10] sm:$0xff] }
  0xb5   :  { %318 = vmatpush.msrb.mxu1 %v212_v45  ;;  %255 = vperm.xlu2 %956, %v241_v2  }
  0xb6   :  { %574 = vmatpush.msra.mxu0 %v1206_v6  ;;  %v1470_v6 = vld [vmem:[%s1686_s4 + $0x10] sm:$0xff] }
  0xb7   :  { %319 = vmatpush.msrb.mxu1 %v224_v48 }
  0xb8   :  { %575 = vmatpush.msra.mxu0 %v1216_v10  ;;  %v1696_v10 = vld [vmem:[#allocation16_spill] sm:$0xff] }
  0xb9   :  { %320 = vmatpush.msrb.mxu1 %v234_v24 }
  0xba   :  { %911 = vmatmul.msk.f32.vlgmr.msrb.gmra.mxu1 %vm263_vm0, %v1436_v40  ;;  %576 = vmatpush.msra.mxu0 %v1228_v14 }
  0xbb   :  { %593 = vmatpush.msra.mxu1 %v1198_v3  ;;  %908 = vmatmul.msk.f32.gmra.mxu0 %vm263_vm0, %v1451_v51  ;;  %v1487_v3 = vld [vmem:[%s1686_s4 + $0x18] sm:$0xff]  ;;  %s1131_s4 = smov [#allocation9]  }
  0xbc   :  { %577 = vmatpush.msra.mxu0 %v1240_v18  ;;  %v634_v18 = vld [vmem:[#allocation2 + $0x28] sm:$0xff]  ;;  %s886_s25 = sshll.u32 %s1131_s4, 4  ;;  %s887_s25 = int_to_ptr.vmem [resolvable:$true] %s886_s25 }
  0xbd   :  { %594 = vmatpush.msra.mxu1 %v1208_v7  ;;  %656 = vperm.xlu2 %956, %v241_v2   ;;  %v1695_v7 = vld [vmem:[#allocation15_spill] sm:$0xff] }
  0xbe   :  { %578 = vmatpush.msra.mxu0 %v1252_v22 }
  0xbf   :  { %595 = vmatpush.msra.mxu1 %v1218_v11 }
  0xc0   :  { %579 = vmatpush.msra.mxu0 %v1264_v26 }
  0xc1   :  { %596 = vmatpush.msra.mxu1 %v1230_v15 }
  0xc2   :  { %912 = vmatmul.msk.f32.gmra.mxu1 %vm263_vm0, %v1451_v51  ;;  %580 = vmatpush.msra.mxu0 %v1276_v30 }
  0xc3   :  { %597 = vmatpush.msra.mxu1 %v1242_v19  ;;  %909 = vmatmul.msk.f32.gmra.mxu0 %vm263_vm0, %v1470_v6  ;;  %v246_v19 = vpop.permute.xlu0 %245 }
  0xc4   :  { %581 = vmatpush.msra.mxu0 %v1288_v34 }
  0xc5   :  { %598 = vmatpush.msra.mxu1 %v1254_v23 }
  0xc6   :  { %582 = vmatpush.msra.mxu0 %v1300_v38 }
  0xc7   :  { %599 = vmatpush.msra.mxu1 %v1266_v27 }
  0xc8   :  { %583 = vmatpush.msra.mxu0 %v1312_v42 }
  0xc9   :  { %600 = vmatpush.msra.mxu1 %v1278_v31 }
  0xca   :  { %913 = vmatmul.msk.f32.gmra.mxu1 %vm263_vm0, %v1470_v6  ;;  %584 = vmatpush.msra.mxu0 %v1324_v46 }
  0xcb   :  { %601 = vmatpush.msra.mxu1 %v1290_v35  ;;  %910 = vmatmul.msk.f32.gmra.mxu0 %vm263_vm0, %v1487_v3  ;;  %v251_v27 = vpop.permute.xlu0 %250 }
  0xcc   :  { %585 = vmatpush.msra.mxu0 %v1336_v50 }
  0xcd   :  { %602 = vmatpush.msra.mxu1 %v1302_v39 }
  0xce   :  { %586 = vmatpush.msra.mxu0 %v1344_v54 }
  0xcf   :  { %603 = vmatpush.msra.mxu1 %v1314_v43 }
  0xd0   :  { %587 = vmatpush.msra.mxu0 %v1350_v58 }
  0xd1   :  { %604 = vmatpush.msra.mxu1 %v1326_v47 }
  0xd2   :  { %914 = vmatmul.msk.f32.gmra.mxu1 %vm263_vm0, %v1487_v3  ;;  %588 = vmatpush.msra.mxu0 %v1356_v62  ;;  %v550_v11 = vpop.f32.mrf.mxu2  ;;  %v570_v14 = vpop.f32.mrf.mxu3 }
  0xd3   :  { %605 = vmatpush.msra.mxu1 %v1695_v7  ;;  %589 = vmatmul.f32.vlgmr.msra.gmra.mxu0 %v1410_v12  ;;  %v571_v15 = vadd.f32 %v570_v14, %v550_v11  ;;  %v261_v1 = vpop.permute.xlu0 %260 }
  0xd5   :  { %606 = vmatpush.msra.mxu1 %v1696_v10  ;;  %940 = vmatpush.msra.mxu2 %v571_v15 }
  0xd6   :  { %689 = vmatpush.msrb.mxu0 %v571_v15 }
  0xd7   :  { %607 = vmatpush.msra.mxu1 %v1352_v59  ;;  %941 = vmatpush.msra.mxu2 %v1402_v8 }
  0xd8   :  { %690 = vmatpush.msrb.mxu0 %v1402_v8 }
  0xd9   :  { %608 = vmatpush.msra.mxu1 %v1358_v63  ;;  %942 = vmatpush.msra.mxu2 %v634_v18 }
  0xda   :  { %609 = vmatmul.f32.vlgmr.msra.gmra.mxu1 %v1415_v13  ;;  %691 = vmatpush.msrb.mxu0 %v634_v18 }
  0xdb   :  { %927 = vmatmul.msk.f32.vlgmr.msra.gmra.mxu2 %vm263_vm0, %v1451_v51  ;;  %926 = vmatmul.msk.f32.vlgmr.msrb.gmra.mxu0 %vm263_vm0, %v1436_v40 }
  0xe3   :  { %928 = vmatmul.msk.f32.gmra.mxu2 %vm263_vm0, %v1470_v6 }
  0xeb   :  { %929 = vmatmul.msk.f32.gmra.mxu2 %vm263_vm0, %v1487_v3 }
 0x10f   :  { %v256_v46 = vpop.permute.xlu2 %255 }
 0x130   :  { %v293_v22 = vpop.f32.mrf.mxu0 }
 0x131   :  { %v294_v23 = vadd.f32 %v293_v22, %v246_v19 }
 0x133   :  { %v915_v26 = vmul.f32 -1.442695, %v294_v23 }
 0x135   :  { %957 = vpow2.f32 %v915_v26 }
 0x137   :  { %v322_v30 = vpop.f32.mrf.mxu1 }
 0x138   :  { %v323_v31 = vadd.f32 %v322_v30, %v246_v19  ;;  %v296_v34 = vpop.f32.mrf.mxu0 }
 0x139   :  { %v297_v35 = vadd.f32 %v296_v34, %v251_v27 }
 0x13a   :  { %v916_v38 = vmul.f32 -1.442695, %v323_v31 }
 0x13b   :  { %v958_v39 = vpop.eup %957  ;;  %v917_v42 = vmul.f32 -1.442695, %v297_v35 }
 0x13c   :  { %v340_v43 = vadd.f32 1.0, %v958_v39  ;;  %959 = vpow2.f32 %v916_v38 }
 0x13d   :  { %961 = vpow2.f32 %v917_v42 }
 0x13e   :  { %963 = vrcp.f32 %v340_v43  ;;  %v351_v24 = vand.u32 2147483647, %v340_v43  ;;  %v353_v33 = vand.u32 2147483648, %v340_v43  ;;  %vm347_vm1 = vweird.f32 %v340_v43 }
 0x13f   :  { %v325_v47 = vpop.f32.mrf.mxu1 }
 0x140   :  { %v326_v50 = vadd.f32 %v325_v47, %v251_v27  ;;  %v299_v52 = vpop.f32.mrf.mxu0  ;;  %vm1541_vm3 = vcmp.eq.f32.partialorder %v351_v24, 8.507059e+37  ;;  %v354_v10 = vor.u32 1.1754944e-38, %v353_v33  ;;  %v450_v47 = vld [vmem:[#allocation3] sm:$0xff]  ;;  %v451_v24 = vld [vmem:[#allocation3 + $0x8] sm:$0xff] }
 0x141   :  { %v300_v53 = vadd.f32 %v299_v52, %v256_v46 }
 0x142   :  { %v960_v54 = vpop.eup %959  ;;  %v918_v55 = vmul.f32 -1.442695, %v326_v50 }
 0x143   :  { %v962_v56 = vpop.eup %961  ;;  %v1522_v57 = vadd.f32 1.0, %v960_v54  ;;  %v919_v58 = vmul.f32 -1.442695, %v300_v53 }
 0x144   :  { %v1524_v59 = vpop.eup %963  ;;  %v378_v60 = vadd.f32 1.0, %v962_v56  ;;  %965 = vpow2.f32 %v918_v55 }
 0x145   :  { %v343_v61 = vmul.f32 %v1524_v59, %v340_v43  ;;  %967 = vrcp.f32 %v1522_v57  ;;  %vm348_vm2 = vweird.f32 %v1524_v59  ;;  %vm362_vm7 = vweird.f32 %v1522_v57 }
 0x146   :  { %969 = vrcp.f32 %v378_v60  ;;  %v391_v48 = vand.u32 2147483648, %v378_v60  ;;  %v389_v49 = vand.u32 2147483647, %v378_v60  ;;  %vm385_vm4 = vweird.f32 %v378_v60  ;;  %vm1551_vm6 = vmor %vm347_vm1, %vm348_vm2 }
 0x147   :  { %971 = vpow2.f32 %v919_v58  ;;  %v328_v62 = vpop.f32.mrf.mxu1  ;;  %v344_v63 = vsub.f32 1.0, %v343_v61  ;;  %v366_v22 = vand.u32 2147483647, %v1522_v57  ;;  %v368_v27 = vand.u32 2147483648, %v1522_v57 }
 0x148   :  { %v329_v0 = vadd.f32 %v328_v62, %v256_v46  ;;  %v302_v4 = vpop.f32.mrf.mxu0  ;;  %v392_v34 = vor.u32 1.1754944e-38, %v391_v48  ;;  %vm1569_vm9 = vcmp.eq.f32.partialorder %v389_v49, 8.507059e+37 }
 0x149   :  { %v303_v13 = vadd.f32 %v302_v4, %v261_v1  ;;  %v345_v21 = vmul.f32 %v1524_v59, %v344_v63  ;;  %vm1584_vm11 = vcmp.eq.f32.partialorder %v366_v22, 8.507059e+37 }
 0x14a   :  { %v966_v5 = vpop.eup %965  ;;  %v920_v8 = vmul.f32 -1.442695, %v329_v0 }
 0x14b   :  { %v1528_v9 = vpop.eup %967  ;;  %v1530_v12 = vadd.f32 1.0, %v966_v5  ;;  %v346_v41 = vadd.f32 %v1524_v59, %v345_v21 }
 0x14c   :  { %v970_v17 = vpop.eup %969  ;;  %v358_v20 = vmul.f32 %v1528_v9, %v1522_v57  ;;  %973 = vpow2.f32 %v920_v8  ;;  %vm363_vm10 = vweird.f32 %v1528_v9 }
 0x14d   :  { %v972_v25 = vpop.eup %971  ;;  %v381_v28 = vmul.f32 %v970_v17, %v378_v60  ;;  %975 = vrcp.f32 %v1530_v12  ;;  %vm386_vm5 = vweird.f32 %v970_v17  ;;  %v350_v26 = vsel %vm1551_vm6, %v1524_v59, %v346_v41  ;;  %vm1597_vm13 = vmor %vm362_vm7, %vm363_vm10 }
 0x14e   :  { %v359_v29 = vsub.f32 1.0, %v358_v20  ;;  %v1536_v32 = vadd.f32 1.0, %v972_v25  ;;  %977 = vtanh.f32 %v303_v13  ;;  %vm1564_vm8 = vmor %vm385_vm4, %vm386_vm5  ;;  %v406_v43 = vand.u32 2147483648, %v1530_v12 }
 0x14f   :  { %v382_v36 = vsub.f32 1.0, %v381_v28  ;;  %v331_v37 = vpop.f32.mrf.mxu1  ;;  %v355_v53 = vsel %vm1541_vm3, %v354_v10, %v350_v26  ;;  %v404_v55 = vand.u32 2147483647, %v1530_v12  ;;  %vm400_vm14 = vweird.f32 %v1530_v12 }
 0x150   :  { %979 = vrcp.f32 %v1536_v32  ;;  %v332_v2 = vadd.f32 %v331_v37, %v261_v1  ;;  %v360_v11 = vmul.f32 %v1528_v9, %v359_v29  ;;  %v590_v38 = vpop.f32.mrf.mxu0  ;;  %v369_v1 = vor.u32 1.1754944e-38, %v368_v27  ;;  %v1648_v27 = vpop.permute.xlu1 %646 }
 0x151   :  { %v383_v45 = vmul.f32 %v970_v17, %v382_v36  ;;  %v407_v5 = vor.u32 1.1754944e-38, %v406_v43  ;;  %vm423_vm1 = vweird.f32 %v1536_v32  ;;  %vm405_vm3 = vcmp.eq.f32.partialorder %v404_v55, 8.507059e+37  ;;  %v1654_v43 = vpop.permute.xlu2 %656 }
 0x152   :  { %v974_v7 = vpop.eup %973  ;;  %981 = vtanh.f32 %v332_v2  ;;  %v361_v50 = vadd.f32 %v1528_v9, %v360_v11  ;;  %v427_v37 = vand.u32 2147483647, %v1536_v32 }
 0x153   :  { %v1546_v14 = vpop.eup %975  ;;  %v1548_v15 = vadd.f32 1.0, %v974_v7  ;;  %v384_v19 = vadd.f32 %v970_v17, %v383_v45 }
 0x154   :  { %v396_v23 = vmul.f32 %v1546_v14, %v1530_v12  ;;  %v978_v30 = vpop.eup %977  ;;  %vm401_vm12 = vweird.f32 %v1546_v14  ;;  %v365_v8 = vsel %vm1597_vm13, %v1528_v9, %v361_v50  ;;  %v429_v12 = vand.u32 2147483648, %v1536_v32  ;;  %v635_v9 = vld [vmem:[#allocation2 + $0x10] sm:$0xff] }
 0x155   :  { %983 = vrcp.f32 %v1548_v15  ;;  %v388_v46 = vsel %vm1564_vm8, %v970_v17, %v384_v19  ;;  %v454_v63 = vmul.f32 %v978_v30, %v355_v53  ;;  %vm1608_vm15 = vmor %vm400_vm14, %vm401_vm12  ;;  %v370_v33 = vsel %vm1584_vm11, %v369_v1, %v365_v8 }
 0x156   :  { %v1574_v39 = vpop.eup %979  ;;  %v397_v42 = vsub.f32 1.0, %v396_v23  ;;  %v393_v59 = vsel %vm1569_vm9, %v392_v34, %v388_v46  ;;  %v430_v7 = vor.u32 1.1754944e-38, %v429_v12  ;;  %vm428_vm6 = vcmp.eq.f32.partialorder %v427_v37, 8.507059e+37  ;;  %v851_v37 = vld [vmem:[#allocation3 + $0x10] sm:$0xff] }
 0x157   :  { %v419_v52 = vmul.f32 %v1574_v39, %v1536_v32  ;;  %v610_v56 = vpop.f32.mrf.mxu1  ;;  %v452_v62 = vmul.f32 %v450_v47, %v393_v59  ;;  %vm424_vm2 = vweird.f32 %v1574_v39  ;;  %v444_v10 = vand.u32 2147483648, %v1548_v15 }
 0x158   :  { %v398_v58 = vmul.f32 %v1546_v14, %v397_v42  ;;  %v611_v60 = vadd.f32 %v610_v56, %v590_v38  ;;  %v982_v4 = vpop.eup %981  ;;  %vm1630_vm4 = vmor %vm423_vm1, %vm424_vm2  ;;  %vm438_vm7 = vweird.f32 %v1548_v15  ;;  %v1651_v34 = vpop.permute.xlu1 %651 }
 0x159   :  { %v420_v61 = vsub.f32 1.0, %v419_v52  ;;  %v456_v21 = vadd.f32 %v454_v63, %v452_v62  ;;  %v455_v45 = vmul.f32 %v982_v4, %v370_v33  ;;  %v445_v19 = vor.u32 1.1754944e-38, %v444_v10 }
 0x15a   :  { %v399_v13 = vadd.f32 %v1546_v14, %v398_v58  ;;  %718 = vmatpush.msrb.mxu1 %v611_v60  ;;  %943 = vmatpush.msra.mxu3 %v611_v60 }
 0x15b   :  { %v984_v17 = vpop.eup %983  ;;  %v421_v20 = vmul.f32 %v1574_v39, %v420_v61  ;;  %985 = vtanh.f32 %v456_v21  ;;  %464 = vst [vmem:[#allocation9] sm:$0xff] %v456_v21 }
 0x15c   :  { %v434_v25 = vmul.f32 %v984_v17, %v1548_v15  ;;  %v403_v28 = vsel %vm1608_vm15, %v1546_v14, %v399_v13  ;;  %719 = vmatpush.msrb.mxu1 %v1420_v16  ;;  %944 = vmatpush.msra.mxu3 %v1420_v16  ;;  %vm439_vm5 = vweird.f32 %v984_v17 }
 0x15d   :  { %v422_v29 = vadd.f32 %v1574_v39, %v421_v20  ;;  %v408_v36 = vsel %vm405_vm3, %v407_v5, %v403_v28  ;;  %vm440_vm8 = vmor %vm438_vm7, %vm439_vm5 }
 0x15e   :  { %v435_v41 = vsub.f32 1.0, %v434_v25  ;;  %v453_v44 = vmul.f32 %v451_v24, %v408_v36  ;;  %720 = vmatpush.msrb.mxu1 %v635_v9  ;;  %945 = vmatpush.msra.mxu3 %v635_v9  ;;  %v696_v35 = vpop.f32.mrf.mxu2 }
 0x15f   :  { %930 = vmatmul.msk.f32.vlgmr.msrb.gmra.mxu1 %vm263_vm0, %v1436_v40  ;;  %931 = vmatmul.msk.f32.vlgmr.msra.gmra.mxu3 %vm263_vm0, %v1451_v51  ;;  %v426_v2 = vsel %vm1630_vm4, %v1574_v39, %v422_v29  ;;  %v442_v40 = vand.u32 2147483647, %v1548_v15  ;;  %v693_v15 = vpop.f32.mrf.mxu0  ;;  %v697_v38 = vadd.f32 %v696_v35, %v1651_v34 }
 0x160   :  { %v436_v48 = vmul.f32 %v984_v17, %v435_v41  ;;  %v457_v49 = vadd.f32 %v455_v45, %v453_v44  ;;  %v431_v51 = vsel %vm428_vm6, %v430_v7, %v426_v2  ;;  %v694_v30 = vadd.f32 %v693_v15, %v1648_v27  ;;  %v1657_v62 = vpop.permute.xlu1 %661 }
 0x161   :  { %v986_v11 = vpop.eup %985  ;;  %vm443_vm9 = vcmp.eq.f32.partialorder %v442_v40, 8.507059e+37 }
 0x162   :  { %v437_v32 = vadd.f32 %v984_v17, %v436_v48  ;;  %987 = vtanh.f32 %v457_v49  ;;  %465 = vst [vmem:[#allocation9 + $0x8] sm:$0xff] %v457_v49  ;;  %v460_v14 = vmul.f32 %v986_v11, %v431_v51  ;;  %v934_v31 = vmul.f32 -1.442695, %v694_v30 }
 0x164   :  { %v441_v18 = vsel %vm440_vm8, %v984_v17, %v437_v32  ;;  %462 = vst [vmem:[#allocation8] sm:$0xff] %v460_v14  ;;  %989 = vpow2.f32 %v934_v31  ;;  %v852_v17 = vld [vmem:[#allocation3 + $0x18] sm:$0xff] }
 0x165   :  { %v446_v23 = vsel %vm443_vm9, %v445_v19, %v441_v18 }
 0x166   :  { %v699_v46 = vpop.f32.mrf.mxu2 }
 0x167   :  { %932 = vmatmul.msk.f32.gmra.mxu3 %vm263_vm0, %v1470_v6  ;;  %v936_v6 = vmul.f32 -1.442695, %v697_v38 }
 0x168   :  { %v988_v22 = vpop.eup %987 }
 0x169   :  { %v461_v26 = vmul.f32 %v988_v22, %v446_v23  ;;  %991 = vpow2.f32 %v936_v6 }
 0x16a   :  { %v990_v39 = vpop.eup %989 }
 0x16b   :  { %463 = vst [vmem:[#allocation8 + $0x8] sm:$0xff] %v461_v26  ;;  %v740_v42 = vadd.f32 1.0, %v990_v39 }
 0x16d   :  { %993 = vrcp.f32 %v740_v42  ;;  %v753_v13 = vand.u32 2147483648, %v740_v42  ;;  %vm747_vm12 = vweird.f32 %v740_v42  ;;  %v751_v21 = vand.u32 2147483647, %v740_v42 }
 0x16e   :  { %v702_v63 = vpop.f32.mrf.mxu2 }
 0x16f   :  { %933 = vmatmul.msk.f32.gmra.mxu3 %vm263_vm0, %v1487_v3  ;;  %v700_v3 = vadd.f32 %v699_v46, %v1654_v43  ;;  %v992_v47 = vpop.eup %991  ;;  %v703_v0 = vadd.f32 %v702_v63, %v1657_v62  ;;  %v754_v24 = vor.u32 1.1754944e-38, %v753_v13  ;;  %vm752_vm15 = vcmp.eq.f32.partialorder %v751_v21, 8.507059e+37 }
 0x170   :  { %v778_v52 = vadd.f32 1.0, %v992_v47 }
 0x171   :  { %v938_v50 = vmul.f32 -1.442695, %v700_v3 }
 0x172   :  { %v791_v1 = vand.u32 2147483648, %v778_v52  ;;  %vm785_vm0 = vweird.f32 %v778_v52  ;;  %v789_v28 = vand.u32 2147483647, %v778_v52 }
 0x173   :  { %995 = vpow2.f32 %v938_v50  ;;  %v994_v53 = vpop.eup %993 }
 0x174   :  { %997 = vrcp.f32 %v778_v52  ;;  %v743_v55 = vmul.f32 %v994_v53, %v740_v42  ;;  %v792_v57 = vor.u32 1.1754944e-38, %v791_v1  ;;  %vm748_vm13 = vweird.f32 %v994_v53 }
 0x175   :  { %vm749_vm14 = vmor %vm747_vm12, %vm748_vm13  ;;  %vm790_vm1 = vcmp.eq.f32.partialorder %v789_v28, 8.507059e+37 }
 0x176   :  { %v744_v60 = vsub.f32 1.0, %v743_v55 }
 0x178   :  { %v745_v5 = vmul.f32 %v994_v53, %v744_v60 }
 0x179   :  { %v996_v54 = vpop.eup %995 }
 0x17a   :  { %v998_v56 = vpop.eup %997  ;;  %v816_v58 = vadd.f32 1.0, %v996_v54  ;;  %v746_v12 = vadd.f32 %v994_v53, %v745_v5 }
 0x17b   :  { %v781_v59 = vmul.f32 %v998_v56, %v778_v52  ;;  %vm786_vm10 = vweird.f32 %v998_v56 }
 0x17c   :  { %999 = vrcp.f32 %v816_v58  ;;  %vm1660_vm11 = vmor %vm785_vm0, %vm786_vm10  ;;  %v750_v33 = vsel %vm749_vm14, %v994_v53, %v746_v12  ;;  %v829_v48 = vand.u32 2147483648, %v816_v58  ;;  %vm823_vm2 = vweird.f32 %v816_v58 }
 0x17d   :  { %v782_v61 = vsub.f32 1.0, %v781_v59  ;;  %1001 = vtanh.f32 %v703_v0  ;;  %v755_v41 = vsel %vm752_vm15, %v754_v24, %v750_v33  ;;  %v827_v2 = vand.u32 2147483647, %v816_v58 }
 0x17e   :  { %v830_v10 = vor.u32 1.1754944e-38, %v829_v48 }
 0x17f   :  { %v783_v4 = vmul.f32 %v998_v56, %v782_v61  ;;  %vm828_vm5 = vcmp.eq.f32.partialorder %v827_v2, 8.507059e+37 }
 0x181   :  { %v784_v9 = vadd.f32 %v998_v56, %v783_v4 }
 0x182   :  { %v1000_v8 = vpop.eup %999 }
 0x183   :  { %v819_v20 = vmul.f32 %v1000_v8, %v816_v58  ;;  %v1002_v29 = vpop.eup %1001  ;;  %v788_v36 = vsel %vm1660_vm11, %v998_v56, %v784_v9  ;;  %vm824_vm3 = vweird.f32 %v1000_v8 }
 0x184   :  { %v793_v45 = vsel %vm790_vm1, %v792_v57, %v788_v36  ;;  %v855_v16 = vmul.f32 %v1002_v29, %v755_v41  ;;  %vm825_vm4 = vmor %vm823_vm2, %vm824_vm3 }
 0x185   :  { %v820_v25 = vsub.f32 1.0, %v819_v20  ;;  %v853_v49 = vmul.f32 %v851_v37, %v793_v45 }
 0x187   :  { %v821_v44 = vmul.f32 %v1000_v8, %v820_v25  ;;  %v857_v7 = vadd.f32 %v855_v16, %v853_v49 }
 0x189   :  { %v822_v32 = vadd.f32 %v1000_v8, %v821_v44  ;;  %1003 = vtanh.f32 %v857_v7  ;;  %867 = vst [vmem:[#allocation9 + $0x10] sm:$0xff] %v857_v7 }
 0x18b   :  { %v826_v11 = vsel %vm825_vm4, %v1000_v8, %v822_v32 }
 0x18c   :  { %v831_v40 = vsel %vm828_vm5, %v830_v10, %v826_v11 }
 0x18f   :  { %v1004_v51 = vpop.eup %1003 }
 0x190   :  { %v861_v14 = vmul.f32 %v1004_v51, %v831_v40 }
 0x192   :  { %864 = vst [vmem:[#allocation8 + $0x10] sm:$0xff] %v861_v14 }
 0x1dc   :  { %v722_v18 = vpop.f32.mrf.mxu1 }
 0x1dd   :  { %v723_v19 = vadd.f32 %v722_v18, %v1648_v27 }
 0x1df   :  { %v935_v22 = vmul.f32 -1.442695, %v723_v19 }
 0x1e1   :  { %1005 = vpow2.f32 %v935_v22 }
 0x1e2   :  { %v725_v23 = vpop.f32.mrf.mxu3 }
 0x1e3   :  { %v726_v26 = vadd.f32 %v725_v23, %v1651_v34 }
 0x1e5   :  { %v937_v15 = vmul.f32 -1.442695, %v726_v26 }
 0x1e7   :  { %v1006_v30 = vpop.eup %1005  ;;  %1007 = vpow2.f32 %v937_v15 }
 0x1e8   :  { %v741_v31 = vadd.f32 1.0, %v1006_v30 }
 0x1ea   :  { %1009 = vrcp.f32 %v741_v31  ;;  %v728_v35 = vpop.f32.mrf.mxu3  ;;  %vm762_vm7 = vweird.f32 %v741_v31  ;;  %v766_v59 = vand.u32 2147483647, %v741_v31 }
 0x1eb   :  { %v729_v38 = vadd.f32 %v728_v35, %v1654_v43  ;;  %v768_v43 = vand.u32 2147483648, %v741_v31 }
 0x1ec   :  { %vm767_vm10 = vcmp.eq.f32.partialorder %v766_v59, 8.507059e+37 }
 0x1ed   :  { %v1008_v6 = vpop.eup %1007  ;;  %v939_v39 = vmul.f32 -1.442695, %v729_v38 }
 0x1ee   :  { %v779_v42 = vadd.f32 1.0, %v1008_v6 }
 0x1ef   :  { %1011 = vpow2.f32 %v939_v39 }
 0x1f0   :  { %v1010_v46 = vpop.eup %1009  ;;  %1013 = vrcp.f32 %v779_v42  ;;  %v806_v60 = vand.u32 2147483648, %v779_v42  ;;  %v804_v0 = vand.u32 2147483647, %v779_v42  ;;  %vm800_vm0 = vweird.f32 %v779_v42 }
 0x1f1   :  { %v758_v27 = vmul.f32 %v1010_v46, %v741_v31  ;;  %vm763_vm6 = vweird.f32 %v1010_v46 }
 0x1f2   :  { %v731_v3 = vpop.f32.mrf.mxu3  ;;  %vm764_vm8 = vmor %vm762_vm7, %vm763_vm6  ;;  %v807_v8 = vor.u32 1.1754944e-38, %v806_v60  ;;  %vm805_vm12 = vcmp.eq.f32.partialorder %v804_v0, 8.507059e+37 }
 0x1f3   :  { %v759_v47 = vsub.f32 1.0, %v758_v27  ;;  %v732_v50 = vadd.f32 %v731_v3, %v1657_v62  ;;  %v769_v62 = vor.u32 1.1754944e-38, %v768_v43 }
 0x1f5   :  { %v1012_v34 = vpop.eup %1011  ;;  %v760_v52 = vmul.f32 %v1010_v46, %v759_v47  ;;  %1015 = vtanh.f32 %v732_v50 }
 0x1f6   :  { %v1014_v53 = vpop.eup %1013  ;;  %v817_v54 = vadd.f32 1.0, %v1012_v34 }
 0x1f7   :  { %v796_v55 = vmul.f32 %v1014_v53, %v779_v42  ;;  %v761_v56 = vadd.f32 %v1010_v46, %v760_v52  ;;  %vm801_vm9 = vweird.f32 %v1014_v53 }
 0x1f8   :  { %1017 = vrcp.f32 %v817_v54  ;;  %vm802_vm11 = vmor %vm800_vm0, %vm801_vm9  ;;  %v844_v33 = vand.u32 2147483648, %v817_v54  ;;  %vm838_vm14 = vweird.f32 %v817_v54  ;;  %v842_v36 = vand.u32 2147483647, %v817_v54 }
 0x1f9   :  { %v797_v58 = vsub.f32 1.0, %v796_v55  ;;  %v765_v63 = vsel %vm764_vm8, %v1010_v46, %v761_v56 }
 0x1fa   :  { %v770_v13 = vsel %vm767_vm10, %v769_v62, %v765_v63  ;;  %v845_v41 = vor.u32 1.1754944e-38, %v844_v33  ;;  %vm843_vm1 = vcmp.eq.f32.partialorder %v842_v36, 8.507059e+37 }
 0x1fb   :  { %v798_v61 = vmul.f32 %v1014_v53, %v797_v58  ;;  %v1016_v1 = vpop.eup %1015 }
 0x1fc   :  { %v856_v9 = vmul.f32 %v1016_v1, %v770_v13 }
 0x1fd   :  { %v799_v4 = vadd.f32 %v1014_v53, %v798_v61 }
 0x1fe   :  { %v1018_v5 = vpop.eup %1017 }
 0x1ff   :  { %v834_v57 = vmul.f32 %v1018_v5, %v817_v54  ;;  %v803_v20 = vsel %vm802_vm11, %v1014_v53, %v799_v4  ;;  %vm839_vm13 = vweird.f32 %v1018_v5 }
 0x200   :  { %v808_v12 = vsel %vm805_vm12, %v807_v8, %v803_v20  ;;  %vm840_vm15 = vmor %vm838_vm14, %vm839_vm13 }
 0x201   :  { %v835_v21 = vsub.f32 1.0, %v834_v57  ;;  %v854_v24 = vmul.f32 %v852_v17, %v808_v12 }
 0x203   :  { %v836_v25 = vmul.f32 %v1018_v5, %v835_v21  ;;  %v858_v28 = vadd.f32 %v856_v9, %v854_v24 }
 0x205   :  { %v837_v29 = vadd.f32 %v1018_v5, %v836_v25  ;;  %1019 = vtanh.f32 %v858_v28  ;;  %868 = vst [vmem:[#allocation9 + $0x18] sm:$0xff] %v858_v28 }
 0x206   :  { %894 = dma.vmem_to_hbm [thread:$0]  %s887_s25, 512, %s889_s28, [#allocation10], %s1126_s13, %s1126_s13, %s1127_s14  }
 0x207   :  { %v841_v37 = vsel %vm840_vm15, %v1018_v5, %v837_v29 }
 0x208   :  { %v846_v45 = vsel %vm843_vm1, %v845_v41, %v841_v37 }
 0x20b   :  { %v1020_v44 = vpop.eup %1019 }
 0x20c   :  { %v862_v16 = vmul.f32 %v1020_v44, %v846_v45 }
 0x20e   :  { %865 = vst [vmem:[#allocation8 + $0x18] sm:$0xff] %v862_v16 }
 0x20f   :  { %881 = dma.vmem_to_hbm [thread:$0]  %s874_s29, 512, %s876_s9, [#allocation5], %s1126_s13, %s1126_s13, %s1127_s14  }
 0x210   :  { %1121 = dma.done.wait [#allocation5], 512  }
 0x211   :  { %1122 = vsyncadd [#allocation5], 4294966784 }
 0x212   :  { %1123 = dma.done.wait [#allocation10], 512  }
 0x213   :  { %1124 = vsyncadd [#allocation10], 4294966784 }
 0x214   :  { %903 = vsyncpa [#allocation4], 1 }
 0x215   :  { %904 = vsyncpa [#allocation7], 1 }
 0x216   :  { %905 = vsyncpa [#allocation5], 1 }
 0x217   :  { %906 = vsyncpa [#allocation10], 1 }

</bundles_post_ra>
